<compile_context>
chip_gen: v5e
topology: v5e:2x2
jax: 0.10.0
libtpu: 0.0.40
codegen_flags: <defaults>
</compile_context>

<pallas_src>
import math

import jax
import jax.numpy as jnp
from jax.experimental import pallas as pl
from jax.experimental.pallas import tpu as pltpu

# ---- MLP2 config (hidden sizes chosen lane-dense: multiples of 128) ----
B = 2                        # batch
S = 8                        # sequence length
ROWS = B * S                 # 16 rows processed in one shot
HIDDEN = 128                 # hidden_size
HIDDEN_C = 4 * HIDDEN        # hidden_c = 512
LN_EPS = 1e-5                # nn.LayerNorm default eps
DROP_P = 0.0                 # inference forward: dropout == identity

_INV_SQRT2 = 1.0 / math.sqrt(2.0)


def _mid_dtype():
    """bf16 elementwise middle only where VPU/EUP are bf16-native (v6e/v7x)."""
    try:
        kind = jax.devices()[0].device_kind.lower()
    except Exception:  # pragma: no cover - fall back conservatively
        return jnp.float32
    if any(tag in kind for tag in ("v2", "v3", "v4", "v5")):
        return jnp.float32
    return jnp.bfloat16


MID_DTYPE = _mid_dtype()


def _mlp2_kernel(x_ref, vec_ref, w1_hbm, w2_hbm, out_ref, w1_vmem, w2_vmem, sem):
    """Whole MLP2 block, one invocation, weights DMA'd manually so they overlap compute.

    x_ref   : (ROWS, HIDDEN)     f32  VMEM   residual stream (B*S rows)
    vec_ref : (4, HIDDEN_C)      f32  VMEM   packed small params:
                row 0 = LN gamma (first HIDDEN lanes), row 1 = LN beta,
                row 2 = b1 (HIDDEN_C),                row 3 = b2 (first HIDDEN lanes)
    w1_hbm  : (HIDDEN, HIDDEN_C) bf16 ANY    fc1 weight, stored (in, out)
    w2_hbm  : (HIDDEN_C, HIDDEN) bf16 ANY    fc2 weight, stored (in, out)
    w1_vmem / w2_vmem : VMEM scratch landing buffers for the two weight DMAs
    sem     : DMA semaphores, shape (2,)
    """
    # Kick off both weight DMAs immediately; they overlap LayerNorm / fc1 / GELU.
    w1_cp = pltpu.make_async_copy(w1_hbm, w1_vmem, sem.at[0])
    w2_cp = pltpu.make_async_copy(w2_hbm, w2_vmem, sem.at[1])
    w1_cp.start()
    w2_cp.start()

    x = x_ref[...].astype(jnp.float32)                      # (ROWS, HIDDEN)
    vecs = vec_ref[...]                                     # (4, HIDDEN_C) f32
    gamma = vecs[0:1, :HIDDEN]                              # (1, HIDDEN)
    beta = vecs[1:2, :HIDDEN]                               # (1, HIDDEN)
    b1 = vecs[2:3, :]                                       # (1, HIDDEN_C)
    b2 = vecs[3:4, :HIDDEN]                                 # (1, HIDDEN)

    # ---------------- LayerNorm (NormPos == 'Before'), f32 ----------------
    mu = jnp.mean(x, axis=-1, keepdims=True)
    var = jnp.mean((x - mu) ** 2, axis=-1, keepdims=True)
    ln = (x - mu) * jax.lax.rsqrt(var + LN_EPS) * gamma + beta

    # ---------------- fc1 (bf16 MXU operands, f32 accumulate) ----------------
    w1_cp.wait()                                            # overlapped with LayerNorm
    h1_acc = jnp.dot(ln.astype(jnp.bfloat16), w1_vmem[...],
                     preferred_element_type=jnp.float32)    # (ROWS, HIDDEN_C) f32

    # ---------------- bias + exact erf GELU (MID_DTYPE middle) ----------------
    h1 = h1_acc.astype(MID_DTYPE) + b1.astype(MID_DTYPE)
    # erf evaluated in f32 (EUP has ample slack; guaranteed lowering on all gens);
    # surrounding products stay in MID_DTYPE (bf16 on v6e/v7x).
    erf_t = jax.lax.erf(h1.astype(jnp.float32) * _INV_SQRT2).astype(MID_DTYPE)
    g = h1 * (0.5 * (1.0 + erf_t))                          # exact F.gelu

    # ---------------- fc2 ----------------
    w2_cp.wait()                                            # overlapped with fc1 + GELU
    h2 = jnp.dot(g.astype(jnp.bfloat16), w2_vmem[...],
                 preferred_element_type=jnp.float32) + b2   # (ROWS, HIDDEN) f32

    # dropout(p = 0) == identity ; residual connection
    out_ref[...] = (x + h2).astype(out_ref.dtype)


def make_params(key):
    """Deterministic parameters; small vectors packed into one lane-dense slab."""
    ks = jax.random.split(key, 6)
    std = 0.02
    # weights stored transposed (in, out) so y = x @ W
    w1 = std * jax.random.normal(ks[0], (HIDDEN, HIDDEN_C), jnp.float32)
    w2 = std * jax.random.normal(ks[1], (HIDDEN_C, HIDDEN), jnp.float32)
    gamma = 1.0 + std * jax.random.normal(ks[2], (HIDDEN,), jnp.float32)
    beta = std * jax.random.normal(ks[3], (HIDDEN,), jnp.float32)
    b1 = std * jax.random.normal(ks[4], (HIDDEN_C,), jnp.float32)
    b2 = std * jax.random.normal(ks[5], (HIDDEN,), jnp.float32)
    # pack the 4 small per-feature vectors into ONE (4, HIDDEN_C) f32 slab -> a single DMA
    vecs = jnp.zeros((4, HIDDEN_C), jnp.float32)
    vecs = vecs.at[0, :HIDDEN].set(gamma).at[1, :HIDDEN].set(beta)
    vecs = vecs.at[2, :].set(b1).at[3, :HIDDEN].set(b2)
    return {
        "w1_f32": w1, "w2_f32": w2,                         # true-module weights (reference)
        "w1_bf16": w1.astype(jnp.bfloat16),                 # MXU-native, half DMA bytes
        "w2_bf16": w2.astype(jnp.bfloat16),
        "vecs": vecs,
    }


def mlp2_forward(x, p):
    """Single-step pallas_call: x / packed params auto-DMA'd, weights manually overlapped."""
    x2d = x.reshape(ROWS, HIDDEN)                           # free reshape (contiguous)
    vmem = pl.BlockSpec(memory_space=pltpu.MemorySpace.VMEM)
    hbm = pl.BlockSpec(memory_space=pl.ANY)                 # raw refs, DMA'd in-kernel
    out = pl.pallas_call(
        _mlp2_kernel,
        out_shape=jax.ShapeDtypeStruct((ROWS, HIDDEN), x.dtype),
        in_specs=[vmem, vmem, hbm, hbm],
        out_specs=vmem,
        scratch_shapes=[
            pltpu.VMEM((HIDDEN, HIDDEN_C), jnp.bfloat16),   # w1 landing buffer
            pltpu.VMEM((HIDDEN_C, HIDDEN), jnp.bfloat16),   # w2 landing buffer
            pltpu.SemaphoreType.DMA((2,)),
        ],
        input_output_aliases={0: 0},                        # out reuses x's buffer
        cost_estimate=pl.CostEstimate(
            flops=2 * 2 * ROWS * HIDDEN * HIDDEN_C,          # two matmuls
            transcendentals=ROWS * HIDDEN_C + ROWS,          # erf + rsqrt
            bytes_accessed=(2 * ROWS * HIDDEN * 4            # x in + out
                            + 4 * HIDDEN_C * 4               # packed vectors
                            + 2 * HIDDEN * HIDDEN_C * 2),    # bf16 weights
        ),
    )(x2d, p["vecs"], p["w1_bf16"], p["w2_bf16"])
    return out.reshape(x.shape)


def mlp2_ref(x, p):
    """Pure-JAX f32 reference with the PyTorch module's exact semantics (erf GELU, f32 weights)."""
    vecs = p["vecs"]
    gamma = vecs[0, :HIDDEN]
    beta = vecs[1, :HIDDEN]
    b1 = vecs[2, :]
    b2 = vecs[3, :HIDDEN]
    w1 = p["w1_f32"]
    w2 = p["w2_f32"]

    mu = jnp.mean(x, axis=-1, keepdims=True)
    var = jnp.mean((x - mu) ** 2, axis=-1, keepdims=True)
    ln = (x - mu) * jax.lax.rsqrt(var + LN_EPS) * gamma + beta

    h1 = ln @ w1 + b1
    g = jax.nn.gelu(h1, approximate=False)                  # exact erf GELU == F.gelu default
    h2 = g @ w2 + b2
    return x + h2                                           # dropout p=0 -> identity


if __name__ == "__main__":
    key = jax.random.PRNGKey(0)
    kx, kp = jax.random.split(key)
    x = jax.random.normal(kx, (B, S, HIDDEN), jnp.float32)
    params = make_params(kp)

    out = jax.block_until_ready(mlp2_forward(x, params))
    ref = mlp2_ref(x, params)

    assert out.shape == (B, S, HIDDEN)
    # Reference is the TRUE f32 module; tolerance covers the kernel's bf16
    # weight + activation quantization (per the review's correctness note).
    max_err = float(jnp.max(jnp.abs(out - ref)))
    assert jnp.allclose(out, ref, atol=5e-3, rtol=5e-3), max_err
    print("KERNEL_OK")
</pallas_src>

<mosaic_0001>
module attributes {stable_mosaic.version = 11 : i64} {
  func.func @_mlp2_kernel(%arg0: memref<16x128xf32, #tpu.memory_space<vmem>>, %arg1: memref<4x512xf32, #tpu.memory_space<vmem>>, %arg2: memref<128x512xbf16, #tpu.memory_space<any>>, %arg3: memref<512x128xbf16, #tpu.memory_space<any>>, %arg4: memref<16x128xf32, #tpu.memory_space<vmem>>, %arg5: memref<128x512xbf16, #tpu.memory_space<vmem>>, %arg6: memref<512x128xbf16, #tpu.memory_space<vmem>>, %arg7: memref<2x!tpu.dma_semaphore, #tpu.memory_space<semaphore_mem>>) attributes {dimension_semantics = [], scalar_prefetch = 0 : i64, scratch_operands = 3 : i64, tpu.core_type = #tpu.core_type<tc>} {
    %c0_i32 = arith.constant 0 : i32
    %0 = tpu.memref_slice %arg7[%c0_i32] : memref<2x!tpu.dma_semaphore, #tpu.memory_space<semaphore_mem>> -> memref<1x!tpu.dma_semaphore, #tpu.memory_space<semaphore_mem>>
    %1 = tpu.memref_squeeze %0 : memref<1x!tpu.dma_semaphore, #tpu.memory_space<semaphore_mem>> -> memref<!tpu.dma_semaphore, #tpu.memory_space<semaphore_mem>>
    tpu.enqueue_dma source(%arg2 : memref<128x512xbf16, #tpu.memory_space<any>>) target(%arg5 : memref<128x512xbf16, #tpu.memory_space<vmem>>) target_semaphore(%1 : memref<!tpu.dma_semaphore, #tpu.memory_space<semaphore_mem>>)
    %c1_i32 = arith.constant 1 : i32
    %2 = tpu.memref_slice %arg7[%c1_i32] : memref<2x!tpu.dma_semaphore, #tpu.memory_space<semaphore_mem>> -> memref<1x!tpu.dma_semaphore, #tpu.memory_space<semaphore_mem>>
    %3 = tpu.memref_squeeze %2 : memref<1x!tpu.dma_semaphore, #tpu.memory_space<semaphore_mem>> -> memref<!tpu.dma_semaphore, #tpu.memory_space<semaphore_mem>>
    tpu.enqueue_dma source(%arg3 : memref<512x128xbf16, #tpu.memory_space<any>>) target(%arg6 : memref<512x128xbf16, #tpu.memory_space<vmem>>) target_semaphore(%3 : memref<!tpu.dma_semaphore, #tpu.memory_space<semaphore_mem>>)
    %c0 = arith.constant 0 : index
    %c0_0 = arith.constant 0 : index
    %4 = vector.load %arg0[%c0, %c0_0] : memref<16x128xf32, #tpu.memory_space<vmem>>, vector<16x128xf32>
    %c0_1 = arith.constant 0 : index
    %c0_2 = arith.constant 0 : index
    %5 = vector.load %arg1[%c0_1, %c0_2] : memref<4x512xf32, #tpu.memory_space<vmem>>, vector<4x512xf32>
    %6 = vector.extract_strided_slice %5 {offsets = [0, 0], sizes = [1, 128], strides = [1, 1]} : vector<4x512xf32> to vector<1x128xf32>
    %7 = vector.extract_strided_slice %5 {offsets = [1, 0], sizes = [1, 128], strides = [1, 1]} : vector<4x512xf32> to vector<1x128xf32>
    %8 = vector.extract_strided_slice %5 {offsets = [2, 0], sizes = [1, 512], strides = [1, 1]} : vector<4x512xf32> to vector<1x512xf32>
    %9 = vector.extract_strided_slice %5 {offsets = [3, 0], sizes = [1, 128], strides = [1, 1]} : vector<4x512xf32> to vector<1x128xf32>
    %cst = arith.constant dense<0.000000e+00> : vector<16xf32>
    %10 = vector.multi_reduction <add>, %4, %cst [1] : vector<16x128xf32> to vector<16xf32>
    %11 = vector.shape_cast %10 : vector<16xf32> to vector<16x1xf32>
    %cst_3 = arith.constant 1.280000e+02 : f32
    %12 = vector.broadcast %cst_3 : f32 to vector<16x1xf32>
    %13 = arith.divf %11, %12 : vector<16x1xf32>
    %14 = vector.broadcast %13 : vector<16x1xf32> to vector<16x128xf32>
    %15 = arith.subf %4, %14 : vector<16x128xf32>
    %16 = arith.mulf %15, %15 : vector<16x128xf32>
    %cst_4 = arith.constant dense<0.000000e+00> : vector<16xf32>
    %17 = vector.multi_reduction <add>, %16, %cst_4 [1] : vector<16x128xf32> to vector<16xf32>
    %18 = vector.shape_cast %17 : vector<16xf32> to vector<16x1xf32>
    %cst_5 = arith.constant 1.280000e+02 : f32
    %19 = vector.broadcast %cst_5 : f32 to vector<16x1xf32>
    %20 = arith.divf %18, %19 : vector<16x1xf32>
    %21 = vector.broadcast %13 : vector<16x1xf32> to vector<16x128xf32>
    %22 = arith.subf %4, %21 : vector<16x128xf32>
    %cst_6 = arith.constant 9.99999974E-6 : f32
    %23 = vector.broadcast %cst_6 : f32 to vector<16x1xf32>
    %24 = arith.addf %20, %23 : vector<16x1xf32>
    %25 = math.rsqrt %24 : vector<16x1xf32>
    %26 = vector.broadcast %25 : vector<16x1xf32> to vector<16x128xf32>
    %27 = arith.mulf %22, %26 : vector<16x128xf32>
    %28 = vector.broadcast %6 : vector<1x128xf32> to vector<16x128xf32>
    %29 = arith.mulf %27, %28 : vector<16x128xf32>
    %30 = vector.broadcast %7 : vector<1x128xf32> to vector<16x128xf32>
    %31 = arith.addf %29, %30 : vector<16x128xf32>
    %c0_i32_7 = arith.constant 0 : i32
    %32 = tpu.memref_slice %arg7[%c0_i32_7] : memref<2x!tpu.dma_semaphore, #tpu.memory_space<semaphore_mem>> -> memref<1x!tpu.dma_semaphore, #tpu.memory_space<semaphore_mem>>
    %33 = tpu.memref_squeeze %32 : memref<1x!tpu.dma_semaphore, #tpu.memory_space<semaphore_mem>> -> memref<!tpu.dma_semaphore, #tpu.memory_space<semaphore_mem>>
    tpu.wait_dma2 semaphore(%33 : memref<!tpu.dma_semaphore, #tpu.memory_space<semaphore_mem>>) src(%arg2 : memref<128x512xbf16, #tpu.memory_space<any>>) dst(%arg5 : memref<128x512xbf16, #tpu.memory_space<vmem>>)
    %34 = arith.truncf %31 : vector<16x128xf32> to vector<16x128xbf16>
    %c0_8 = arith.constant 0 : index
    %c0_9 = arith.constant 0 : index
    %35 = vector.load %arg5[%c0_8, %c0_9] : memref<128x512xbf16, #tpu.memory_space<vmem>>, vector<128x512xbf16>
    %cst_10 = arith.constant dense<0.000000e+00> : vector<16x512xf32>
    %36 = tpu.matmul %34, %35, %cst_10 {dimension_numbers = #tpu.dot_dimension_numbers<[1], [0], [0], [1], [0, 0, 1, 1], [], []>} : vector<16x128xbf16>, vector<128x512xbf16>, vector<16x512xf32> -> vector<16x512xf32>
    %37 = arith.truncf %36 : vector<16x512xf32> to vector<16x512xbf16>
    %38 = arith.truncf %8 : vector<1x512xf32> to vector<1x512xbf16>
    %39 = vector.broadcast %38 : vector<1x512xbf16> to vector<16x512xbf16>
    %40 = arith.addf %37, %39 : vector<16x512xbf16>
    %41 = arith.extf %40 : vector<16x512xbf16> to vector<16x512xf32>
    %cst_11 = arith.constant 0.707106769 : f32
    %42 = vector.broadcast %cst_11 : f32 to vector<16x512xf32>
    %43 = arith.mulf %41, %42 : vector<16x512xf32>
    %44 = math.erf %43 : vector<16x512xf32>
    %45 = arith.truncf %44 : vector<16x512xf32> to vector<16x512xbf16>
    %cst_12 = arith.constant 1.000000e+00 : bf16
    %46 = vector.broadcast %cst_12 : bf16 to vector<16x512xbf16>
    %47 = arith.addf %46, %45 : vector<16x512xbf16>
    %cst_13 = arith.constant 5.000000e-01 : bf16
    %48 = vector.broadcast %cst_13 : bf16 to vector<16x512xbf16>
    %49 = arith.mulf %48, %47 : vector<16x512xbf16>
    %50 = arith.mulf %40, %49 : vector<16x512xbf16>
    %c1_i32_14 = arith.constant 1 : i32
    %51 = tpu.memref_slice %arg7[%c1_i32_14] : memref<2x!tpu.dma_semaphore, #tpu.memory_space<semaphore_mem>> -> memref<1x!tpu.dma_semaphore, #tpu.memory_space<semaphore_mem>>
    %52 = tpu.memref_squeeze %51 : memref<1x!tpu.dma_semaphore, #tpu.memory_space<semaphore_mem>> -> memref<!tpu.dma_semaphore, #tpu.memory_space<semaphore_mem>>
    tpu.wait_dma2 semaphore(%52 : memref<!tpu.dma_semaphore, #tpu.memory_space<semaphore_mem>>) src(%arg3 : memref<512x128xbf16, #tpu.memory_space<any>>) dst(%arg6 : memref<512x128xbf16, #tpu.memory_space<vmem>>)
    %c0_15 = arith.constant 0 : index
    %c0_16 = arith.constant 0 : index
    %53 = vector.load %arg6[%c0_15, %c0_16] : memref<512x128xbf16, #tpu.memory_space<vmem>>, vector<512x128xbf16>
    %cst_17 = arith.constant dense<0.000000e+00> : vector<16x128xf32>
    %54 = tpu.matmul %50, %53, %cst_17 {dimension_numbers = #tpu.dot_dimension_numbers<[1], [0], [0], [1], [0, 0, 1, 1], [], []>} : vector<16x512xbf16>, vector<512x128xbf16>, vector<16x128xf32> -> vector<16x128xf32>
    %55 = vector.broadcast %9 : vector<1x128xf32> to vector<16x128xf32>
    %56 = arith.addf %54, %55 : vector<16x128xf32>
    %57 = arith.addf %4, %56 : vector<16x128xf32>
    %c0_18 = arith.constant 0 : index
    %c0_19 = arith.constant 0 : index
    %58 = vector.load %arg4[%c0_18, %c0_19] : memref<16x128xf32, #tpu.memory_space<vmem>>, vector<16x128xf32>
    tpu.vector_store %arg4[%c0_18, %c0_19], %57 {strides = array<i32>} : memref<16x128xf32, #tpu.memory_space<vmem>>, vector<16x128xf32>,
    return
  }
}

</mosaic_0001>

<bundles_post_ra>
// kernel: tpu_custom_call.1
= control target key start
LH: loop header
LB: loop body
LE: loop exit
PB: predicated region body
PF: predicated region fallthrough
CT: control target
= control target key end

     0   :  { %9 = vsyncpa [#allocation6], 0  ;;  %s2115_s0 = inlined_call_operand.hbm [shape: f32[16,128], index: 0, kind: input, shape index: {}, may-alias: {0,4}]   ;;  %s2116_s1 = inlined_call_operand.vmem [shape: f32[4,512], index: 1, kind: input, shape index: {}]   ;;  %s2117_s2 = inlined_call_operand.hbm [shape: bf16[128,512], index: 2, kind: input, shape index: {}]   ;;  %s2118_s3 = inlined_call_operand.hbm [shape: bf16[512,128], index: 3, kind: input, shape index: {}]   ;;  %s2119_s4 = inlined_call_operand.hbm [shape: f32[16,128], index: 4, kind: output, shape index: {}, may-alias: {0,4}]  }
   0x1   :  { %10 = vsyncpa [#allocation7], 0  ;;  %s15_s17 = sshll.u32 %s2115_s0, 4  ;;  %s1649_s18 = smov [#allocation5]   ;;  %s16_s17 = int_to_ptr.hbm [resolvable:$true] %s15_s17 }
   0x2   :  { %s17_s19 = sshll.u32 %s1649_s18, 4  ;;  %s1650_s20 = smov 128   ;;  %s18_s19 = int_to_ptr.vmem [resolvable:$true] %s17_s19 }
   0x3   :  { %s1651_s21 = smov 8  }
   0x4   :  { %23 = dma.hbm_to_vmem [thread:$0]  %s16_s17, 256, %s18_s19, [#allocation6], %s1650_s20, %s1650_s20, %s1651_s21  }
   0x5   :  { %1641 = dma.done.wait [#allocation6], 256  }
   0x6   :  { %1642 = vsyncadd [#allocation6], 4294967040  ;;  %v1690_v0 = vld [vmem:[%s2116_s1 + $0x8] sm:$0xff]  ;;  %v1692_v1 = vld [vmem:[#allocation5] sm:$0xff]  ;;  %v1652_v3 = vmov 128.0   ;;  %s37_s25 = sshll.u32 %s2117_s2, 4  ;;  %s38_s25 = int_to_ptr.hbm [resolvable:$true] %s37_s25 }
   0x7   :  { %61 = vadd.xlane.f32.xlu0 %v1692_v1  ;;  %v1695_v2 = vld [vmem:[#allocation5 + $0x8] sm:$0xff]  ;;  %1523 = vrcp.f32 %v1652_v3  ;;  %s1653_s26 = smov [#allocation2]   ;;  %s51_s30 = sshll.u32 %s2118_s3, 4  ;;  %v1709_v28 = vld [vmem:[%s2116_s1] sm:$0xff]  ;;  %s52_s30 = int_to_ptr.hbm [resolvable:$true] %s51_s30 }
   0x8   :  { %s39_s27 = sshll.u32 %s1653_s26, 4  ;;  %s1654_s5 = smov [#allocation3]   ;;  %v108_v33 = vperm.slane %v1709_v28, 0  ;;  %v111_v36 = vperm.slane %v1709_v28, 1  ;;  %s40_s27 = int_to_ptr.vmem [resolvable:$true] %s39_s27 }
   0x9   :  { %42 = dma.hbm_to_vmem [thread:$0]  %s38_s25, 4096, %s40_s27, [#allocation4] }
   0xa   :  { %s53_s6 = sshll.u32 %s1654_s5, 4  ;;  %s54_s6 = int_to_ptr.vmem [resolvable:$true] %s53_s6 }
   0xb   :  { %56 = dma.hbm_to_vmem [thread:$0]  %s52_s30, 4096, %s54_s6, [#allocation4 + $0x1] }
   0xd   :  { %v1524_v4 = vpop.eup %1523 }
   0xe   :  { %v66_v5 = vmul.f32 128.0, %v1524_v4  ;;  %vm70_vm0 = vweird.f32 %v1524_v4 }
   0xf   :  { %63 = vadd.xlane.f32.xlu0 %v1695_v2 }
  0x10   :  { %v67_v6 = vsub.f32 1.0, %v66_v5 }
  0x12   :  { %v68_v7 = vmul.f32 %v1524_v4, %v67_v6 }
  0x14   :  { %v69_v8 = vadd.f32 %v1524_v4, %v68_v7 }
  0x16   :  { %v71_v9 = vsel %vm70_vm0, %v1524_v4, %v69_v8 }
  0x7a   :  { %v62_v10 = vpop.xlane.xlu0 %61 }
  0x7b   :  { %v72_v11 = vmul.f32 %v71_v9, %v62_v10 }
  0x7d   :  { %v74_v12 = vsub.f32 %v1692_v1, %v72_v11 }
  0x7f   :  { %v76_v13 = vmul.f32 %v74_v12, %v74_v12 }
  0x81   :  { %78 = vadd.xlane.f32.xlu1 %v76_v13 }
  0x82   :  { %v64_v14 = vpop.xlane.xlu0 %63 }
  0x83   :  { %v73_v15 = vmul.f32 %v71_v9, %v64_v14 }
  0x85   :  { %v75_v16 = vsub.f32 %v1695_v2, %v73_v15 }
  0x87   :  { %v77_v17 = vmul.f32 %v75_v16, %v75_v16 }
  0x89   :  { %80 = vadd.xlane.f32.xlu1 %v77_v17 }
  0xf4   :  { %v79_v18 = vpop.xlane.xlu1 %78 }
  0xf5   :  { %v82_v19 = vmul.f32 %v79_v18, %v71_v9 }
  0xf7   :  { %v84_v20 = vadd.f32 1e-05, %v82_v19 }
  0xf9   :  { %1525 = vrsqrt.f32 %v84_v20  ;;  %vm92_vm2 = vweird.f32 %v84_v20 }
  0xfc   :  { %v81_v21 = vpop.xlane.xlu1 %80 }
  0xfd   :  { %v83_v22 = vmul.f32 %v81_v21, %v71_v9 }
  0xff   :  { %v1526_v23 = vpop.eup %1525  ;;  %v85_v24 = vadd.f32 1e-05, %v83_v22 }
 0x100   :  { %v87_v25 = vmul.f32 %v1526_v23, %v84_v20  ;;  %vm93_vm1 = vweird.f32 %v1526_v23 }
 0x101   :  { %1527 = vrsqrt.f32 %v85_v24  ;;  %vm94_vm3 = vmor %vm92_vm2, %vm93_vm1  ;;  %vm102_vm5 = vweird.f32 %v85_v24 }
 0x102   :  { %v88_v26 = vmul.f32 %v1526_v23, %v87_v25 }
 0x104   :  { %v89_v27 = vmul.f32 0.5, %v88_v26 }
 0x106   :  { %v90_v29 = vsub.f32 1.5, %v89_v27 }
 0x107   :  { %v1528_v30 = vpop.eup %1527 }
 0x108   :  { %v91_v31 = vmul.f32 %v1526_v23, %v90_v29  ;;  %v97_v32 = vmul.f32 %v1528_v30, %v85_v24  ;;  %vm103_vm4 = vweird.f32 %v1528_v30 }
 0x109   :  { %vm104_vm6 = vmor %vm102_vm5, %vm103_vm4 }
 0x10a   :  { %v95_v34 = vsel %vm94_vm3, %v1526_v23, %v91_v31  ;;  %v98_v35 = vmul.f32 %v1528_v30, %v97_v32 }
 0x10b   :  { %v106_v37 = vmul.f32 %v95_v34, %v74_v12 }
 0x10c   :  { %v99_v38 = vmul.f32 0.5, %v98_v35 }
 0x10d   :  { %v109_v39 = vmul.f32 %v108_v33, %v106_v37 }
 0x10e   :  { %v100_v40 = vsub.f32 1.5, %v99_v38 }
 0x10f   :  { %v1713_v41 = vadd.f32 %v111_v36, %v109_v39 }
 0x110   :  { %v101_v42 = vmul.f32 %v1528_v30, %v100_v40 }
 0x112   :  { %v105_v43 = vsel %vm104_vm6, %v1528_v30, %v101_v42 }
 0x113   :  { %v107_v44 = vmul.f32 %v105_v43, %v75_v16 }
 0x115   :  { %v110_v45 = vmul.f32 %v108_v33, %v107_v44 }
 0x117   :  { %v1715_v46 = vadd.f32 %v111_v36, %v110_v45 }
 0x118   :  { %1643 = dma.done.wait [#allocation4], 4096 }
 0x119   :  { %1644 = vsyncadd [#allocation4], 4294963200  ;;  %v1300_v47 = vld [vmem:[#allocation2 + $0xe0] sm:$0xf]  ;;  %v1482_v48 = vld [vmem:[#allocation2 + $0xec] sm:$0xf0] }
 0x11a   :  { %v1480_v49 = vld [vmem:[#allocation2 + $0xe4] sm:$0xf]  ;;  %v1301_v50 = vor.u32 %v1482_v48, %v1300_v47  ;;  %v1302_v51 = vld [vmem:[#allocation2 + $0xf0] sm:$0xf0]  ;;  %v1308_v52 = vld [vmem:[#allocation2 + $0xe8] sm:$0xf] }
 0x11b   :  { %v1483_v53 = vld [vmem:[#allocation2 + $0xf4] sm:$0xf0]  ;;  %v1305_v54 = vor.u32 %v1480_v49, %v1302_v51  ;;  %v1481_v56 = vld [vmem:[#allocation2 + $0xec] sm:$0xf]  ;;  %v1310_v57 = vld [vmem:[#allocation2 + $0xf8] sm:$0xf0] }
 0x11c   :  { %v1309_v55 = vor.u32 %v1483_v53, %v1308_v52  ;;  %v1284_v58 = vld [vmem:[#allocation2 + $0xc0] sm:$0xf]  ;;  %311 = vmatpush.bf16.msra.mxu0 %v1301_v50  ;;  %v1313_v59 = vor.u32 %v1481_v56, %v1310_v57  ;;  %v1478_v60 = vld [vmem:[#allocation2 + $0xcc] sm:$0xf0]  ;;  %v1476_v61 = vld [vmem:[#allocation2 + $0xc4] sm:$0xf] }
 0x11d   :  { %v1286_v62 = vld [vmem:[#allocation2 + $0xd0] sm:$0xf0]  ;;  %325 = vmatpush.bf16.msra.mxu1 %v1305_v54  ;;  %v1285_v63 = vor.u32 %v1478_v60, %v1284_v58  ;;  %v1292_v4 = vld [vmem:[#allocation2 + $0xc8] sm:$0xf]  ;;  %v1479_v5 = vld [vmem:[#allocation2 + $0xd4] sm:$0xf0] }
 0x11e   :  { %339 = vmatpush.bf16.msra.mxu2 %v1309_v55  ;;  %v1289_v3 = vor.u32 %v1476_v61, %v1286_v62  ;;  %v1477_v6 = vld [vmem:[#allocation2 + $0xcc] sm:$0xf]  ;;  %353 = vmatpush.bf16.msra.mxu3 %v1313_v59  ;;  %v1293_v7 = vor.u32 %v1479_v5, %v1292_v4  ;;  %v1294_v8 = vld [vmem:[#allocation2 + $0xd8] sm:$0xf0]  ;;  %v1268_v9 = vld [vmem:[#allocation2 + $0xa0] sm:$0xf] }
 0x11f   :  { %v1474_v10 = vld [vmem:[#allocation2 + $0xac] sm:$0xf0]  ;;  %v1297_v11 = vor.u32 %v1477_v6, %v1294_v8  ;;  %v1472_v12 = vld [vmem:[#allocation2 + $0xa4] sm:$0xf]  ;;  %v1270_v13 = vld [vmem:[#allocation2 + $0xb0] sm:$0xf0] }
 0x120   :  { %v1276_v14 = vld [vmem:[#allocation2 + $0xa8] sm:$0xf]  ;;  %312 = vmatpush.bf16.msra.mxu0 %v1285_v63  ;;  %v1269_v15 = vor.u32 %v1474_v10, %v1268_v9  ;;  %v1475_v16 = vld [vmem:[#allocation2 + $0xb4] sm:$0xf0]  ;;  %v1473_v17 = vld [vmem:[#allocation2 + $0xac] sm:$0xf]  ;;  %v1273_v19 = vor.u32 %v1472_v12, %v1270_v13 }
 0x121   :  { %v1278_v18 = vld [vmem:[#allocation2 + $0xb8] sm:$0xf0]  ;;  %326 = vmatpush.bf16.msra.mxu1 %v1289_v3  ;;  %v1277_v20 = vor.u32 %v1475_v16, %v1276_v14  ;;  %v1252_v21 = vld [vmem:[#allocation2 + $0x80] sm:$0xf]  ;;  %v1470_v22 = vld [vmem:[#allocation2 + $0x8c] sm:$0xf0] }
 0x122   :  { %340 = vmatpush.bf16.msra.mxu2 %v1293_v7  ;;  %v1468_v23 = vld [vmem:[#allocation2 + $0x84] sm:$0xf]  ;;  %354 = vmatpush.bf16.msra.mxu3 %v1297_v11  ;;  %v1281_v24 = vor.u32 %v1473_v17, %v1278_v18  ;;  %v1254_v25 = vld [vmem:[#allocation2 + $0x90] sm:$0xf0]  ;;  %v1260_v26 = vld [vmem:[#allocation2 + $0x88] sm:$0xf]  ;;  %v1253_v31 = vor.u32 %v1470_v22, %v1252_v21 }
 0x123   :  { %v1471_v27 = vld [vmem:[#allocation2 + $0x94] sm:$0xf0]  ;;  %v1469_v29 = vld [vmem:[#allocation2 + $0x8c] sm:$0xf]  ;;  %v1262_v30 = vld [vmem:[#allocation2 + $0x98] sm:$0xf0]  ;;  %v1257_v32 = vor.u32 %v1468_v23, %v1254_v25 }
 0x124   :  { %313 = vmatpush.bf16.msra.mxu0 %v1269_v15  ;;  %v1261_v33 = vor.u32 %v1471_v27, %v1260_v26  ;;  %v1236_v34 = vld [vmem:[#allocation2 + $0x60] sm:$0xf]  ;;  %v1466_v35 = vld [vmem:[#allocation2 + $0x6c] sm:$0xf0]  ;;  %v1464_v36 = vld [vmem:[#allocation2 + $0x64] sm:$0xf]  ;;  %v1265_v37 = vor.u32 %v1469_v29, %v1262_v30 }
 0x125   :  { %327 = vmatpush.bf16.msra.mxu1 %v1273_v19  ;;  %v1238_v38 = vld [vmem:[#allocation2 + $0x70] sm:$0xf0]  ;;  %v1244_v39 = vld [vmem:[#allocation2 + $0x68] sm:$0xf]  ;;  %v1467_v40 = vld [vmem:[#allocation2 + $0x74] sm:$0xf0]  ;;  %v1237_v44 = vor.u32 %v1466_v35, %v1236_v34 }
 0x126   :  { %341 = vmatpush.bf16.msra.mxu2 %v1277_v20  ;;  %355 = vmatpush.bf16.msra.mxu3 %v1281_v24  ;;  %v1465_v42 = vld [vmem:[#allocation2 + $0x6c] sm:$0xf]  ;;  %v1246_v43 = vld [vmem:[#allocation2 + $0x78] sm:$0xf0]  ;;  %v1241_v45 = vor.u32 %v1464_v36, %v1238_v38  ;;  %v1245_v47 = vor.u32 %v1467_v40, %v1244_v39  ;;  %v1220_v48 = vld [vmem:[#allocation2 + $0x40] sm:$0xf]  ;;  %v118_v24 = vpack.c.bf16 %v1715_v46, %v1713_v41 }
 0x127   :  { %v1462_v49 = vld [vmem:[#allocation2 + $0x4c] sm:$0xf0]  ;;  %v1460_v50 = vld [vmem:[#allocation2 + $0x44] sm:$0xf]  ;;  %v1249_v51 = vor.u32 %v1465_v42, %v1246_v43  ;;  %v1222_v52 = vld [vmem:[#allocation2 + $0x50] sm:$0xf0] }
 0x128   :  { %314 = vmatpush.bf16.msra.mxu0 %v1253_v31  ;;  %v1228_v53 = vld [vmem:[#allocation2 + $0x48] sm:$0xf]  ;;  %v1463_v54 = vld [vmem:[#allocation2 + $0x54] sm:$0xf0]  ;;  %v1461_v55 = vld [vmem:[#allocation2 + $0x4c] sm:$0xf]  ;;  %v1221_v57 = vor.u32 %v1462_v49, %v1220_v48  ;;  %v1225_v58 = vor.u32 %v1460_v50, %v1222_v52 }
 0x129   :  { %328 = vmatpush.bf16.msra.mxu1 %v1257_v32  ;;  %v1230_v56 = vld [vmem:[#allocation2 + $0x58] sm:$0xf0]  ;;  %v1229_v59 = vor.u32 %v1463_v54, %v1228_v53  ;;  %v1204_v60 = vld [vmem:[#allocation2 + $0x20] sm:$0xf]  ;;  %v1458_v61 = vld [vmem:[#allocation2 + $0x2c] sm:$0xf0] }
 0x12a   :  { %342 = vmatpush.bf16.msra.mxu2 %v1261_v33  ;;  %356 = vmatpush.bf16.msra.mxu3 %v1265_v37  ;;  %v1456_v62 = vld [vmem:[#allocation2 + $0x24] sm:$0xf]  ;;  %v1233_v63 = vor.u32 %v1461_v55, %v1230_v56  ;;  %v1206_v3 = vld [vmem:[#allocation2 + $0x30] sm:$0xf0]  ;;  %v1212_v4 = vld [vmem:[#allocation2 + $0x28] sm:$0xf]  ;;  %v1205_v8 = vor.u32 %v1458_v61, %v1204_v60 }
 0x12b   :  { %v1459_v5 = vld [vmem:[#allocation2 + $0x34] sm:$0xf0]  ;;  %v1457_v6 = vld [vmem:[#allocation2 + $0x2c] sm:$0xf]  ;;  %v1214_v7 = vld [vmem:[#allocation2 + $0x38] sm:$0xf0]  ;;  %v1209_v9 = vor.u32 %v1456_v62, %v1206_v3 }
 0x12c   :  { %315 = vmatpush.bf16.msra.mxu0 %v1237_v44  ;;  %v1213_v10 = vor.u32 %v1459_v5, %v1212_v4  ;;  %v1188_v11 = vld [vmem:[#allocation2] sm:$0xf]  ;;  %v1454_v12 = vld [vmem:[#allocation2 + $0xc] sm:$0xf0]  ;;  %v1452_v13 = vld [vmem:[#allocation2 + $0x4] sm:$0xf]  ;;  %v1217_v14 = vor.u32 %v1457_v6, %v1214_v7 }
 0x12d   :  { %329 = vmatpush.bf16.msra.mxu1 %v1241_v45  ;;  %v1190_v15 = vld [vmem:[#allocation2 + $0x10] sm:$0xf0]  ;;  %v1196_v16 = vld [vmem:[#allocation2 + $0x8] sm:$0xf]  ;;  %v1455_v17 = vld [vmem:[#allocation2 + $0x14] sm:$0xf0]  ;;  %v1189_v20 = vor.u32 %v1454_v12, %v1188_v11 }
 0x12e   :  { %343 = vmatpush.bf16.msra.mxu2 %v1245_v47  ;;  %357 = vmatpush.bf16.msra.mxu3 %v1249_v51  ;;  %v1453_v18 = vld [vmem:[#allocation2 + $0xc] sm:$0xf]  ;;  %v1198_v19 = vld [vmem:[#allocation2 + $0x18] sm:$0xf0]  ;;  %v1193_v21 = vor.u32 %v1452_v13, %v1190_v15  ;;  %v1197_v22 = vor.u32 %v1455_v17, %v1196_v16  ;;  %v373_v25 = vperm.slane %v1709_v28, 2  ;;  %v374_v26 = vperm.slane %v1709_v28, 6 }
 0x12f   :  { %v1201_v23 = vor.u32 %v1453_v18, %v1198_v19  ;;  %v375_v29 = vperm.slane %v1690_v0, 2  ;;  %v376_v30 = vperm.slane %v1690_v0, 6 }
 0x130   :  { %316 = vmatpush.bf16.msra.mxu0 %v1221_v57  ;;  %v381_v27 = vpack.c.bf16 %v374_v26, %v373_v25 }
 0x131   :  { %330 = vmatpush.bf16.msra.mxu1 %v1225_v58  ;;  %v382_v41 = vpack.c.bf16 %v376_v30, %v375_v29 }
 0x132   :  { %344 = vmatpush.bf16.msra.mxu2 %v1229_v59  ;;  %358 = vmatpush.bf16.msra.mxu3 %v1233_v63  ;;  %v385_v31 = vunpack.c.l.b16 %v381_v27  ;;  %v386_v32 = vunpack.c.h.b16 %v381_v27 }
 0x133   :  { %v387_v34 = vunpack.c.l.b16 %v382_v41  ;;  %v388_v35 = vunpack.c.h.b16 %v382_v41 }
 0x134   :  { %317 = vmatpush.bf16.msra.mxu0 %v1205_v8  ;;  %v389_v46 = vpack.c.b16 %v385_v31, %v385_v31  ;;  %v390_v33 = vpack.c.b16 %v386_v32, %v386_v32 }
 0x135   :  { %331 = vmatpush.bf16.msra.mxu1 %v1209_v9  ;;  %v391_v38 = vpack.c.b16 %v387_v34, %v387_v34  ;;  %v392_v39 = vpack.c.b16 %v388_v35, %v388_v35 }
 0x136   :  { %345 = vmatpush.bf16.msra.mxu2 %v1213_v10  ;;  %359 = vmatpush.bf16.msra.mxu3 %v1217_v14  ;;  %v394_v36 = vpack.i.b16 %v389_v46, %v389_v46  ;;  %v398_v37 = vpack.i.b16 %v390_v33, %v390_v33 }
 0x137   :  { %v402_v45 = vpack.i.b16 %v391_v38, %v391_v38  ;;  %v406_v47 = vpack.i.b16 %v392_v39, %v392_v39 }
 0x138   :  { %318 = vmatpush.bf16.msra.mxu0 %v1189_v20  ;;  %v396_v40 = vperm.slane %v394_v36, 1  ;;  %v400_v42 = vperm.slane %v398_v37, 1 }
 0x139   :  { %332 = vmatpush.bf16.msra.mxu1 %v1193_v21  ;;  %v1723_v52 = vperm.slane %v402_v45, 1  ;;  %v1725_v53 = vperm.slane %v406_v47, 1 }
 0x13a   :  { %346 = vmatpush.bf16.msra.mxu2 %v1197_v22  ;;  %360 = vmatpush.bf16.msra.mxu3 %v1201_v23  ;;  %v417_v49 = vunpack.c.l.bf16 %v396_v40  ;;  %v418_v0 = vunpack.c.l.bf16 %v400_v42 }
 0x13b   :  { %319 = vmatmul.bf16.vlgmr.msra.gmra.mxu0 %v118_v24  ;;  %v419_v60 = vunpack.c.l.bf16 %v1723_v52  ;;  %v420_v61 = vunpack.c.l.bf16 %v1725_v53 }
 0x13c   :  { %333 = vmatmul.bf16.vlgmr.msra.gmra.mxu1 %v118_v24 }
 0x13d   :  { %347 = vmatmul.bf16.vlgmr.msra.gmra.mxu2 %v118_v24  ;;  %361 = vmatmul.bf16.vlgmr.msra.gmra.mxu3 %v118_v24 }
 0x1b8   :  { %v320_v43 = vpop.f32.mrf.mxu0 }
 0x1b9   :  { %v334_v44 = vpop.f32.mrf.mxu1 }
 0x1ba   :  { %v367_v48 = vpack.c.bf16 %v334_v44, %v320_v43 }
 0x1bc   :  { %v409_v50 = vunpack.c.l.bf16 %v367_v48  ;;  %v410_v51 = vunpack.c.h.bf16 %v367_v48 }
 0x1be   :  { %v421_v54 = vadd.f32 %v417_v49, %v409_v50  ;;  %v422_v55 = vadd.f32 %v418_v0, %v410_v51 }
 0x1c0   :  { %v348_v56 = vpop.f32.mrf.mxu2  ;;  %v1727_v57 = vpack.c.bf16 %v422_v55, %v421_v54  ;;  %v362_v58 = vpop.f32.mrf.mxu3 }
 0x1c1   :  { %v368_v59 = vpack.c.bf16 %v362_v58, %v348_v56  ;;  %v322_v3 = vpop.f32.mrf.mxu0  ;;  %v336_v4 = vpop.f32.mrf.mxu1 }
 0x1c2   :  { %v433_v62 = vunpack.c.l.bf16 %v1727_v57  ;;  %v434_v63 = vunpack.c.h.bf16 %v1727_v57  ;;  %v369_v11 = vpack.c.bf16 %v336_v4, %v322_v3 }
 0x1c3   :  { %v411_v5 = vunpack.c.l.bf16 %v368_v59  ;;  %v412_v6 = vunpack.c.h.bf16 %v368_v59 }
 0x1c4   :  { %v1735_v7 = vmul.f32 0.70710677, %v433_v62  ;;  %v1739_v8 = vmul.f32 0.70710677, %v434_v63  ;;  %v413_v19 = vunpack.c.l.bf16 %v369_v11  ;;  %v414_v23 = vunpack.c.h.bf16 %v369_v11 }
 0x1c5   :  { %v423_v9 = vadd.f32 %v419_v60, %v411_v5  ;;  %v424_v10 = vadd.f32 %v420_v61, %v412_v6 }
 0x1c6   :  { %v449_v12 = vmul.f32 %v1735_v7, %v1735_v7  ;;  %v489_v13 = vmul.f32 %v1739_v8, %v1739_v8  ;;  %v425_v46 = vadd.f32 %v417_v49, %v413_v19  ;;  %v426_v33 = vadd.f32 %v418_v0, %v414_v23 }
 0x1c7   :  { %v1749_v14 = vpack.c.bf16 %v424_v10, %v423_v9 }
 0x1c8   :  { %v1751_v15 = vmin.f32 %v449_v12, 16.0  ;;  %v1753_v16 = vmin.f32 %v489_v13, 16.0  ;;  %v1781_v43 = vpack.c.bf16 %v426_v33, %v425_v46 }
 0x1c9   :  { %v435_v17 = vunpack.c.l.bf16 %v1749_v14  ;;  %v436_v18 = vunpack.c.h.bf16 %v1749_v14 }
 0x1ca   :  { %v451_v20 = vmul.f32 2.1237322e-06, %v1751_v15  ;;  %v462_v21 = vmul.f32 3.8918573e-05, %v1751_v15  ;;  %v491_v22 = vmul.f32 2.1237322e-06, %v1753_v16  ;;  %v437_v54 = vunpack.c.l.bf16 %v1781_v43 }
 0x1cb   :  { %v502_v24 = vmul.f32 3.8918573e-05, %v1753_v16  ;;  %v1763_v25 = vmul.f32 0.70710677, %v435_v17  ;;  %v1767_v26 = vmul.f32 0.70710677, %v436_v18 }
 0x1cc   :  { %v463_v27 = vadd.f32 0.001143296, %v462_v21  ;;  %v452_v32 = vadd.f32 0.00028619796, %v451_v20  ;;  %v492_v34 = vadd.f32 0.00028619796, %v491_v22 }
 0x1cd   :  { %v503_v29 = vadd.f32 0.001143296, %v502_v24  ;;  %v529_v30 = vmul.f32 %v1763_v25, %v1763_v25  ;;  %v569_v31 = vmul.f32 %v1767_v26, %v1767_v26  ;;  %v1795_v10 = vmul.f32 0.70710677, %v437_v54 }
 0x1ce   :  { %v464_v41 = vmul.f32 %v463_v27, %v1751_v15  ;;  %v453_v44 = vmul.f32 %v452_v32, %v1751_v15  ;;  %v493_v45 = vmul.f32 %v492_v34, %v1753_v16  ;;  %v438_v27 = vunpack.c.h.bf16 %v1781_v43 }
 0x1cf   :  { %v504_v35 = vmul.f32 %v503_v29, %v1753_v16  ;;  %v1775_v36 = vmin.f32 %v529_v30, 16.0  ;;  %v1777_v37 = vmin.f32 %v569_v31, 16.0  ;;  %v609_v29 = vmul.f32 %v1795_v10, %v1795_v10 }
 0x1d0   :  { %v465_v38 = vadd.f32 0.014752088, %v464_v41  ;;  %v454_v55 = vadd.f32 0.0036580483, %v453_v44  ;;  %v494_v56 = vadd.f32 0.0036580483, %v493_v45 }
 0x1d1   :  { %v505_v39 = vadd.f32 0.014752088, %v504_v35  ;;  %v542_v40 = vmul.f32 3.8918573e-05, %v1775_v36  ;;  %v582_v48 = vmul.f32 3.8918573e-05, %v1777_v37 }
 0x1d2   :  { %v466_v42 = vmul.f32 %v465_v38, %v1751_v15  ;;  %v531_v4 = vmul.f32 2.1237322e-06, %v1775_v36  ;;  %v455_v11 = vmul.f32 %v454_v55, %v1751_v15  ;;  %v495_v12 = vmul.f32 %v494_v56, %v1753_v16  ;;  %v350_v56 = vpop.f32.mrf.mxu2 }
 0x1d3   :  { %v506_v47 = vmul.f32 %v505_v39, %v1753_v16  ;;  %v543_v0 = vadd.f32 0.001143296, %v542_v40  ;;  %v583_v59 = vadd.f32 0.001143296, %v582_v48  ;;  %v571_v24 = vmul.f32 2.1237322e-06, %v1777_v37 }
 0x1d4   :  { %v467_v49 = vadd.f32 0.112945676, %v466_v42  ;;  %v532_v21 = vadd.f32 0.00028619796, %v531_v4  ;;  %v456_v30 = vadd.f32 0.05243302, %v455_v11 }
 0x1d5   :  { %v507_v50 = vadd.f32 0.112945676, %v506_v47  ;;  %v544_v5 = vmul.f32 %v543_v0, %v1775_v36  ;;  %v584_v19 = vmul.f32 %v583_v59, %v1777_v37  ;;  %v496_v31 = vadd.f32 0.05243302, %v495_v12 }
 0x1d6   :  { %v468_v51 = vmul.f32 %v467_v49, %v1751_v15  ;;  %v533_v41 = vmul.f32 %v532_v21, %v1775_v36  ;;  %v572_v33 = vadd.f32 0.00028619796, %v571_v24  ;;  %v1815_v34 = vmul.f32 0.70710677, %v438_v27 }
 0x1d7   :  { %v508_v58 = vmul.f32 %v507_v50, %v1753_v16  ;;  %v545_v22 = vadd.f32 0.014752088, %v544_v5  ;;  %v585_v32 = vadd.f32 0.014752088, %v584_v19  ;;  %v1817_v35 = vmin.f32 %v609_v29, 16.0 }
 0x1d8   :  { %v469_v3 = vadd.f32 0.4994258, %v468_v51  ;;  %v457_v38 = vmul.f32 %v456_v30, %v1751_v15  ;;  %v497_v39 = vmul.f32 %v496_v31, %v1753_v16  ;;  %v534_v42 = vadd.f32 0.0036580483, %v533_v41 }
 0x1d9   :  { %v509_v6 = vadd.f32 0.4994258, %v508_v58  ;;  %v546_v46 = vmul.f32 %v545_v22, %v1775_v36  ;;  %v586_v40 = vmul.f32 %v585_v32, %v1777_v37  ;;  %v573_v47 = vmul.f32 %v572_v33, %v1777_v37  ;;  %v364_v58 = vpop.f32.mrf.mxu3 }
 0x1da   :  { %v470_v9 = vmul.f32 %v469_v3, %v1751_v15  ;;  %v622_v48 = vmul.f32 3.8918573e-05, %v1817_v35  ;;  %v649_v0 = vmul.f32 %v1815_v34, %v1815_v34  ;;  %v458_v50 = vadd.f32 0.18741608, %v457_v38 }
 0x1db   :  { %v510_v13 = vmul.f32 %v509_v6, %v1753_v16  ;;  %v547_v44 = vadd.f32 0.112945676, %v546_v46  ;;  %v498_v51 = vadd.f32 0.18741608, %v497_v39  ;;  %v587_v55 = vadd.f32 0.112945676, %v586_v40 }
 0x1dc   :  { %v1801_v20 = vadd.f32 1.0, %v470_v9  ;;  %v535_v3 = vmul.f32 %v534_v42, %v1775_v36  ;;  %v574_v6 = vadd.f32 0.0036580483, %v573_v47  ;;  %v611_v9 = vmul.f32 2.1237322e-06, %v1817_v35 }
 0x1dd   :  { %v1803_v23 = vadd.f32 1.0, %v510_v13  ;;  %v548_v4 = vmul.f32 %v547_v44, %v1775_v36  ;;  %v623_v11 = vadd.f32 0.001143296, %v622_v48  ;;  %v1837_v12 = vmin.f32 %v649_v0, 16.0 }
 0x1de   :  { %1529 = vrcp.f32 %v1801_v20  ;;  %v370_v13 = vpack.c.bf16 %v364_v58, %v350_v56  ;;  %v459_v19 = vmul.f32 %v458_v50, %v1751_v15  ;;  %v499_v21 = vmul.f32 %v498_v51, %v1753_v16 }
 0x1df   :  { %1531 = vrcp.f32 %v1803_v23  ;;  %v588_v22 = vmul.f32 %v587_v55, %v1777_v37  ;;  %v624_v24 = vmul.f32 %v623_v11, %v1817_v35  ;;  %v536_v30 = vadd.f32 0.05243302, %v535_v3 }
 0x1e0   :  { %v549_v31 = vadd.f32 0.4994258, %v548_v4  ;;  %v575_v41 = vmul.f32 %v574_v6, %v1777_v37  ;;  %v612_v46 = vadd.f32 0.00028619796, %v611_v9  ;;  %v651_v38 = vmul.f32 2.1237322e-06, %v1837_v12 }
 0x1e1   :  { %v625_v33 = vadd.f32 0.014752088, %v624_v24  ;;  %v415_v39 = vunpack.c.l.bf16 %v370_v13  ;;  %v460_v40 = vadd.f32 1.1283791, %v459_v19  ;;  %v500_v42 = vadd.f32 1.1283791, %v499_v21 }
 0x1e2   :  { %v589_v15 = vadd.f32 0.4994258, %v588_v22  ;;  %v416_v44 = vunpack.c.h.bf16 %v370_v13  ;;  %v537_v47 = vmul.f32 %v536_v30, %v1775_v36  ;;  %v550_v48 = vmul.f32 %v549_v31, %v1775_v36 }
 0x1e3   :  { %v626_v0 = vmul.f32 %v625_v33, %v1817_v35  ;;  %v576_v51 = vadd.f32 0.05243302, %v575_v41  ;;  %v613_v55 = vmul.f32 %v612_v46, %v1817_v35  ;;  %v662_v56 = vmul.f32 3.8918573e-05, %v1837_v12 }
 0x1e4   :  { %v1822_v45 = vpop.eup %1529  ;;  %vm477_vm7 = vweird.f32 %v1801_v20  ;;  %v481_v58 = vand.u32 2147483647, %v1801_v20  ;;  %v652_v3 = vadd.f32 0.00028619796, %v651_v38  ;;  %v590_v4 = vmul.f32 %v589_v15, %v1777_v37 }
 0x1e5   :  { %v1826_v49 = vpop.eup %1531  ;;  %v473_v59 = vmul.f32 %v1822_v45, %v1801_v20  ;;  %vm478_vm8 = vweird.f32 %v1822_v45  ;;  %v427_v6 = vadd.f32 %v419_v60, %v415_v39  ;;  %v1859_v11 = vadd.f32 1.0, %v550_v48 }
 0x1e6   :  { %v513_v5 = vmul.f32 %v1826_v49, %v1803_v23  ;;  %v428_v19 = vadd.f32 %v420_v61, %v416_v44  ;;  %vm518_vm9 = vweird.f32 %v1826_v49  ;;  %v614_v22 = vadd.f32 0.0036580483, %v613_v55  ;;  %vm1875_vm11 = vmor %vm477_vm7, %vm478_vm8 }
 0x1e7   :  { %v474_v29 = vsub.f32 1.0, %v473_v59  ;;  %v627_v59 = vadd.f32 0.112945676, %v626_v0  ;;  %vm517_vm10 = vweird.f32 %v1803_v23  ;;  %v523_v52 = vand.u32 2147483648, %v1803_v23 }
 0x1e8   :  { %v514_v32 = vsub.f32 1.0, %v513_v5  ;;  %v663_v5 = vadd.f32 0.001143296, %v662_v56  ;;  %v653_v60 = vmul.f32 %v652_v3, %v1837_v12  ;;  %vm1879_vm12 = vcmp.eq.f32.partialorder %v481_v58, 8.507059e+37  ;;  %vm1889_vm13 = vmor %vm517_vm10, %vm518_vm9 }
 0x1e9   :  { %v475_v16 = vmul.f32 %v1822_v45, %v474_v29  ;;  %v628_v13 = vmul.f32 %v627_v59, %v1817_v35  ;;  %v483_v29 = vand.u32 2147483648, %v1801_v20  ;;  %v521_v30 = vand.u32 2147483647, %v1803_v23 }
 0x1ea   :  { %v515_v50 = vmul.f32 %v1826_v49, %v514_v32  ;;  %v664_v24 = vmul.f32 %v663_v5, %v1837_v12  ;;  %v1884_v31 = vadd.f32 1.0, %v590_v4  ;;  %v538_v20 = vadd.f32 0.18741608, %v537_v47 }
 0x1eb   :  { %v476_v9 = vadd.f32 %v1822_v45, %v475_v16  ;;  %v629_v32 = vadd.f32 0.4994258, %v628_v13  ;;  %1533 = vrcp.f32 %v1859_v11  ;;  %v1894_v33 = vpack.c.bf16 %v428_v19, %v427_v6 }
 0x1ec   :  { %v516_v21 = vadd.f32 %v1826_v49, %v515_v50  ;;  %v615_v38 = vmul.f32 %v614_v22, %v1817_v35  ;;  %v665_v15 = vadd.f32 0.014752088, %v664_v24  ;;  %v484_v44 = vor.u32 1.1754944e-38, %v483_v29 }
 0x1ed   :  { %v480_v41 = vsel %vm1875_vm11, %v1822_v45, %v476_v9  ;;  %v630_v39 = vmul.f32 %v629_v32, %v1817_v35  ;;  %v524_v45 = vor.u32 1.1754944e-38, %v523_v52  ;;  %v577_v16 = vmul.f32 %v576_v51, %v1777_v37 }
 0x1ee   :  { %v520_v23 = vsel %vm1889_vm13, %v1826_v49, %v516_v21  ;;  %v654_v48 = vadd.f32 0.0036580483, %v653_v60  ;;  %vm522_vm14 = vcmp.eq.f32.partialorder %v521_v30, 8.507059e+37  ;;  %1535 = vrcp.f32 %v1884_v31 }
 0x1ef   :  { %v1903_v47 = vadd.f32 1.0, %v630_v39  ;;  %v666_v0 = vmul.f32 %v665_v15, %v1837_v12  ;;  %v485_v49 = vsel %vm1879_vm12, %v484_v44, %v480_v41  ;;  %v525_v50 = vsel %vm522_vm14, %v524_v45, %v520_v23 }
 0x1f0   :  { %v539_v55 = vmul.f32 %v538_v20, %v1775_v36  ;;  %v439_v56 = vunpack.c.l.bf16 %v1894_v33  ;;  %v461_v58 = vmul.f32 %v460_v40, %v1735_v7  ;;  %v501_v51 = vmul.f32 %v500_v42, %v1739_v8 }
 0x1f1   :  { %v616_v59 = vadd.f32 0.05243302, %v615_v38  ;;  %1537 = vrcp.f32 %v1903_v47  ;;  %v1913_v3 = vpop.eup %1533  ;;  %v578_v4 = vadd.f32 0.18741608, %v577_v16  ;;  %v655_v5 = vmul.f32 %v654_v48, %v1837_v12 }
 0x1f2   :  { %v486_v6 = vmul.f32 %v485_v49, %v461_v58  ;;  %v526_v9 = vmul.f32 %v525_v50, %v501_v51  ;;  %v667_v13 = vadd.f32 0.112945676, %v666_v0  ;;  %v440_v19 = vunpack.c.h.bf16 %v1894_v33 }
 0x1f3   :  { %v540_v36 = vadd.f32 1.1283791, %v539_v55  ;;  %v1919_v21 = vmul.f32 0.70710677, %v439_v56  ;;  %v553_v8 = vmul.f32 %v1913_v3, %v1859_v11  ;;  %v617_v40 = vmul.f32 %v616_v59, %v1817_v35 }
 0x1f4   :  { %v1921_v7 = vpop.eup %1535  ;;  %v668_v42 = vmul.f32 %v667_v13, %v1837_v12  ;;  %v1929_v22 = vmul.f32 0.70710677, %v440_v19  ;;  %v563_v24 = vand.u32 2147483648, %v1859_v11  ;;  %v579_v29 = vmul.f32 %v578_v4, %v1777_v37 }
 0x1f5   :  { %v656_v52 = vadd.f32 0.05243302, %v655_v5  ;;  %v689_v60 = vmul.f32 %v1919_v21, %v1919_v21  ;;  %v1314_v61 = vclamps-f32 %v486_v6, 1.0  ;;  %v1315_v30 = vclamps-f32 %v526_v9, 1.0 }
 0x1f6   :  { %v669_v32 = vadd.f32 0.4994258, %v668_v42  ;;  %v729_v41 = vmul.f32 %v1929_v22, %v1929_v22  ;;  %v1940_v46 = vmul.f32 %v540_v36, %v1763_v25  ;;  %v561_v20 = vand.u32 2147483647, %v1859_v11 }
 0x1f7   :  { %v1935_v53 = vpop.eup %1537  ;;  %v593_v37 = vmul.f32 %v1921_v7, %v1884_v31  ;;  %v554_v38 = vsub.f32 1.0, %v553_v8  ;;  %v603_v39 = vand.u32 2147483648, %v1884_v31  ;;  %v618_v15 = vadd.f32 0.18741608, %v617_v40 }
 0x1f8   :  { %v633_v23 = vmul.f32 %v1935_v53, %v1903_v47  ;;  %v670_v44 = vmul.f32 %v669_v32, %v1837_v12  ;;  %v657_v16 = vmul.f32 %v656_v52, %v1837_v12  ;;  %v1950_v48 = vmin.f32 %v689_v60, 16.0 }
 0x1f9   :  { %v1952_v25 = vmin.f32 %v729_v41, 16.0  ;;  %v769_v0 = vpack.c.bf16 %v1315_v30, %v1314_v61  ;;  %v1954_v49 = vor.u32 1.1754944e-38, %v563_v24  ;;  %v1956_v50 = vadd.f32 1.1283791, %v579_v29 }
 0x1fa   :  { %v634_v45 = vsub.f32 1.0, %v633_v23  ;;  %v1958_v55 = vadd.f32 1.0, %v670_v44  ;;  %v594_v58 = vsub.f32 1.0, %v593_v37  ;;  %v691_v59 = vmul.f32 2.1237322e-06, %v1950_v48 }
 0x1fb   :  { %v702_v4 = vmul.f32 3.8918573e-05, %v1950_v48  ;;  %v601_v5 = vand.u32 2147483647, %v1884_v31  ;;  %v619_v6 = vmul.f32 %v618_v15, %v1817_v35  ;;  %v731_v9 = vmul.f32 2.1237322e-06, %v1952_v25 }
 0x1fc   :  { %v635_v51 = vmul.f32 %v1935_v53, %v634_v45  ;;  %1539 = vrcp.f32 %v1958_v55  ;;  %v555_v13 = vmul.f32 %v1913_v3, %v554_v38  ;;  %vm558_vm15 = vweird.f32 %v1913_v3 }
 0x1fd   :  { %v1969_v36 = vor.u32 1.1754944e-38, %v603_v39  ;;  %v658_v8 = vadd.f32 0.18741608, %v657_v16  ;;  %v773_v40 = vunpack.c.l.bf16 %v769_v0  ;;  %vm557_vm0 = vweird.f32 %v1859_v11 }
 0x1fe   :  { %vm598_vm1 = vweird.f32 %v1921_v7  ;;  %v692_v42 = vadd.f32 0.00028619796, %v691_v59  ;;  %v703_v24 = vadd.f32 0.001143296, %v702_v4  ;;  %v774_v29 = vunpack.c.h.bf16 %v769_v0  ;;  %vm2010_vm9 = vmor %vm557_vm0, %vm558_vm15 }
 0x1ff   :  { %v595_v35 = vmul.f32 %v1921_v7, %v594_v58  ;;  %v636_v52 = vadd.f32 %v1935_v53, %v635_v51  ;;  %vm638_vm2 = vweird.f32 %v1935_v53  ;;  %vm597_vm3 = vweird.f32 %v1884_v31 }
 0x200   :  { %v620_v60 = vadd.f32 1.1283791, %v619_v6  ;;  %v643_v61 = vand.u32 2147483648, %v1903_v47  ;;  %v704_v30 = vmul.f32 %v703_v24, %v1950_v48  ;;  %v732_v32 = vadd.f32 0.00028619796, %v731_v9  ;;  %vm2024_vm11 = vmor %vm597_vm3, %vm598_vm1 }
 0x201   :  { %vm637_vm4 = vweird.f32 %v1903_v47  ;;  %v641_v41 = vand.u32 2147483647, %v1903_v47  ;;  %v659_v37 = vmul.f32 %v658_v8, %v1837_v12  ;;  %v742_v23 = vmul.f32 3.8918573e-05, %v1952_v25 }
 0x202   :  { %v1540_v38 = vpop.eup %1539  ;;  %v781_v39 = vadd.f32 1.0, %v773_v40  ;;  %v556_v15 = vadd.f32 %v1913_v3, %v555_v13  ;;  %vm1984_vm5 = vmor %vm637_vm4, %vm638_vm2  ;;  %v693_v45 = vmul.f32 %v692_v42, %v1950_v48  ;;  %v705_v16 = vadd.f32 0.014752088, %v704_v30 }
 0x203   :  { %v782_v0 = vadd.f32 1.0, %v774_v29  ;;  %vm1989_vm6 = vcmp.eq.f32.partialorder %v561_v20, 8.507059e+37  ;;  %v596_v12 = vadd.f32 %v1921_v7, %v595_v35  ;;  %v640_v47 = vsel %vm1984_vm5, %v1935_v53, %v636_v52 }
 0x204   :  { %v673_v51 = vmul.f32 %v1540_v38, %v1958_v55  ;;  %v621_v59 = vmul.f32 %v620_v60, %v1795_v10  ;;  %v644_v4 = vor.u32 1.1754944e-38, %v643_v61  ;;  %v706_v6 = vmul.f32 %v705_v16, %v1950_v48 }
 0x205   :  { %v733_v9 = vmul.f32 %v732_v32, %v1952_v25  ;;  %vm2001_vm7 = vcmp.eq.f32.partialorder %v601_v5, 8.507059e+37  ;;  %vm642_vm8 = vcmp.eq.f32.partialorder %v641_v41, 8.507059e+37  ;;  %v660_v13 = vadd.f32 1.1283791, %v659_v37 }
 0x206   :  { %v674_v8 = vsub.f32 1.0, %v673_v51  ;;  %v743_v40 = vadd.f32 0.001143296, %v742_v23  ;;  %v645_v42 = vsel %vm642_vm8, %v644_v4, %v640_v47  ;;  %v683_v53 = vand.u32 2147483648, %v1958_v55 }
 0x207   :  { %v694_v24 = vadd.f32 0.0036580483, %v693_v45  ;;  %v707_v29 = vadd.f32 0.112945676, %v706_v6  ;;  %vm678_vm10 = vweird.f32 %v1540_v38  ;;  %v681_v35 = vand.u32 2147483647, %v1958_v55 }
 0x208   :  { %v675_v5 = vmul.f32 %v1540_v38, %v674_v8  ;;  %v744_v52 = vmul.f32 %v743_v40, %v1952_v25  ;;  %v789_v60 = vpack.c.bf16 %v782_v0, %v781_v39  ;;  %v560_v61 = vsel %vm2010_vm9, %v1913_v3, %v556_v15 }
 0x209   :  { %v708_v30 = vmul.f32 %v707_v29, %v1950_v48  ;;  %v734_v32 = vadd.f32 0.0036580483, %v733_v9  ;;  %v646_v41 = vmul.f32 %v645_v42, %v621_v59  ;;  %vm677_vm12 = vweird.f32 %v1958_v55 }
 0x20a   :  { %v676_v37 = vadd.f32 %v1540_v38, %v675_v5  ;;  %v745_v23 = vadd.f32 0.014752088, %v744_v52  ;;  %v600_v3 = vsel %vm2024_vm11, %v1921_v7, %v596_v12  ;;  %vm679_vm13 = vmor %vm677_vm12, %vm678_vm10  ;;  %v684_v39 = vor.u32 1.1754944e-38, %v683_v53 }
 0x20b   :  { %v695_v15 = vmul.f32 %v694_v24, %v1950_v48  ;;  %v709_v44 = vadd.f32 0.4994258, %v708_v30  ;;  %v661_v31 = vmul.f32 %v660_v13, %v1815_v34  ;;  %vm682_vm14 = vcmp.eq.f32.partialorder %v681_v35, 8.507059e+37 }
 0x20c   :  { %v680_v45 = vsel %vm679_vm13, %v1540_v38, %v676_v37  ;;  %v746_v16 = vmul.f32 %v745_v23, %v1952_v25  ;;  %v565_v55 = vsel %vm1989_vm6, %v1954_v49, %v560_v61  ;;  %v735_v7 = vmul.f32 %v734_v32, %v1952_v25 }
 0x20d   :  { %v685_v0 = vsel %vm682_vm14, %v684_v39, %v680_v45  ;;  %v710_v47 = vmul.f32 %v709_v44, %v1950_v48  ;;  %v793_v12 = vunpack.c.l.bf16 %v789_v60  ;;  %v1318_v51 = vclamps-f32 %v646_v41, 1.0 }
 0x20e   :  { %v686_v59 = vmul.f32 %v685_v0, %v661_v31  ;;  %v747_v4 = vadd.f32 0.112945676, %v746_v16  ;;  %v794_v6 = vunpack.c.h.bf16 %v789_v60  ;;  %v605_v34 = vsel %vm2001_vm7, %v1969_v36, %v600_v3 }
 0x20f   :  { %v696_v38 = vadd.f32 0.05243302, %v695_v15  ;;  %v711_v9 = vadd.f32 1.0, %v710_v47  ;;  %v581_v58 = vmul.f32 %v1956_v50, %v1767_v26  ;;  %v566_v8 = vmul.f32 %v565_v55, %v1940_v46 }
 0x210   :  { %v1319_v49 = vclamps-f32 %v686_v59, 1.0  ;;  %v748_v13 = vmul.f32 %v747_v4, %v1952_v25  ;;  %v736_v40 = vadd.f32 0.05243302, %v735_v7  ;;  %v801_v29 = vmul.f32 0.5, %v793_v12 }
 0x211   :  { %1541 = vrcp.f32 %v711_v9  ;;  %v606_v42 = vmul.f32 %v605_v34, %v581_v58  ;;  %v802_v10 = vmul.f32 0.5, %v794_v6  ;;  %v697_v20 = vmul.f32 %v696_v38, %v1950_v48 }
 0x212   :  { %v771_v53 = vpack.c.bf16 %v1319_v49, %v1318_v51  ;;  %v749_v24 = vadd.f32 0.4994258, %v748_v13  ;;  %v1316_v52 = vclamps-f32 %v566_v8, 1.0  ;;  %v737_v26 = vmul.f32 %v736_v40, %v1952_v25 }
 0x213   :  { %v1317_v50 = vclamps-f32 %v606_v42, 1.0  ;;  %v809_v32 = vpack.c.bf16 %v802_v10, %v801_v29  ;;  %v698_v11 = vadd.f32 0.18741608, %v697_v20  ;;  %v723_v16 = vand.u32 2147483648, %v711_v9 }
 0x214   :  { %v777_v36 = vunpack.c.l.bf16 %v771_v53  ;;  %v778_v5 = vunpack.c.h.bf16 %v771_v53  ;;  %v750_v35 = vmul.f32 %v749_v24, %v1952_v25  ;;  %v738_v23 = vadd.f32 0.18741608, %v737_v26 }
 0x215   :  { %v770_v3 = vpack.c.bf16 %v1317_v50, %v1316_v52  ;;  %v813_v31 = vunpack.c.l.bf16 %v809_v32  ;;  %v699_v45 = vmul.f32 %v698_v11, %v1950_v48  ;;  %v814_v7 = vunpack.c.h.bf16 %v809_v32 }
 0x216   :  { %v785_v60 = vadd.f32 1.0, %v777_v36  ;;  %v786_v61 = vadd.f32 1.0, %v778_v5  ;;  %v751_v46 = vadd.f32 1.0, %v750_v35  ;;  %v721_v12 = vand.u32 2147483647, %v711_v9 }
 0x217   :  { %v1542_v30 = vpop.eup %1541  ;;  %v739_v51 = vmul.f32 %v738_v23, %v1952_v25  ;;  %v775_v4 = vunpack.c.l.bf16 %v770_v3  ;;  %vm717_vm0 = vweird.f32 %v711_v9  ;;  %v2054_v38 = vmul.f32 %v813_v31, %v433_v62 }
 0x218   :  { %v791_v41 = vpack.c.bf16 %v786_v61, %v785_v60  ;;  %v713_v37 = vmul.f32 %v1542_v30, %v711_v9  ;;  %1543 = vrcp.f32 %v751_v46  ;;  %vm718_vm15 = vweird.f32 %v1542_v30 }
 0x219   :  { %v776_v58 = vunpack.c.h.bf16 %v770_v3  ;;  %v700_v48 = vadd.f32 1.1283791, %v699_v45  ;;  %vm719_vm1 = vmor %vm717_vm0, %vm718_vm15  ;;  %v724_v42 = vor.u32 1.1754944e-38, %v723_v16  ;;  %v2058_v25 = vmul.f32 %v814_v7, %v434_v63 }
 0x21a   :  { %v797_v39 = vunpack.c.l.bf16 %v791_v41  ;;  %v798_v15 = vunpack.c.h.bf16 %v791_v41  ;;  %v714_v44 = vsub.f32 1.0, %v713_v37  ;;  %vm722_vm2 = vcmp.eq.f32.partialorder %v721_v12, 8.507059e+37 }
 0x21b   :  { %v740_v53 = vadd.f32 1.1283791, %v739_v51  ;;  %v763_v10 = vand.u32 2147483648, %v751_v46  ;;  %v701_v20 = vmul.f32 %v700_v48, %v1919_v21  ;;  %v761_v57 = vand.u32 2147483647, %v751_v46 }
 0x21c   :  { %v805_v55 = vmul.f32 0.5, %v797_v39  ;;  %v806_v0 = vmul.f32 0.5, %v798_v15  ;;  %v715_v47 = vmul.f32 %v1542_v30, %v714_v44  ;;  %v783_v63 = vadd.f32 1.0, %v775_v4 }
 0x21d   :  { %vm757_vm4 = vweird.f32 %v751_v46  ;;  %v764_v43 = vor.u32 1.1754944e-38, %v763_v10  ;;  %vm762_vm6 = vcmp.eq.f32.partialorder %v761_v57, 8.507059e+37 }
 0x21e   :  { %v1544_v59 = vpop.eup %1543  ;;  %v811_v6 = vpack.c.bf16 %v806_v0, %v805_v55  ;;  %v716_v34 = vadd.f32 %v1542_v30, %v715_v47 }
 0x21f   :  { %v753_v49 = vmul.f32 %v1544_v59, %v751_v46  ;;  %vm758_vm3 = vweird.f32 %v1544_v59 }
 0x220   :  { %v817_v13 = vunpack.c.l.bf16 %v811_v6  ;;  %v818_v8 = vunpack.c.h.bf16 %v811_v6  ;;  %v720_v40 = vsel %vm719_vm1, %v1542_v30, %v716_v34  ;;  %vm759_vm5 = vmor %vm757_vm4, %vm758_vm3 }
 0x221   :  { %v754_v24 = vsub.f32 1.0, %v753_v49  ;;  %v725_v29 = vsel %vm722_vm2, %v724_v42, %v720_v40 }
 0x222   :  { %v2062_v9 = vmul.f32 %v817_v13, %v437_v54  ;;  %v2066_v62 = vmul.f32 %v818_v8, %v438_v27  ;;  %v784_v54 = vadd.f32 1.0, %v776_v58  ;;  %v726_v52 = vmul.f32 %v725_v29, %v701_v20 }
 0x223   :  { %v755_v36 = vmul.f32 %v1544_v59, %v754_v24  ;;  %v741_v27 = vmul.f32 %v740_v53, %v1929_v22 }
 0x224   :  { %v829_v5 = vpack.c.bf16 %v2062_v9, %v2054_v38  ;;  %v830_v35 = vpack.c.bf16 %v2066_v62, %v2058_v25  ;;  %v790_v60 = vpack.c.bf16 %v784_v54, %v783_v63  ;;  %v1320_v61 = vclamps-f32 %v726_v52, 1.0 }
 0x225   :  { %v756_v26 = vadd.f32 %v1544_v59, %v755_v36 }
 0x226   :  { %v795_v11 = vunpack.c.l.bf16 %v790_v60  ;;  %v796_v41 = vunpack.c.h.bf16 %v790_v60 }
 0x227   :  { %v760_v50 = vsel %vm759_vm5, %v1544_v59, %v756_v26 }
 0x228   :  { %v765_v21 = vsel %vm762_vm6, %v764_v43, %v760_v50  ;;  %v803_v39 = vmul.f32 0.5, %v795_v11  ;;  %v804_v15 = vmul.f32 0.5, %v796_v41 }
 0x229   :  { %v766_v30 = vmul.f32 %v765_v21, %v741_v27 }
 0x22a   :  { %v810_v45 = vpack.c.bf16 %v804_v15, %v803_v39 }
 0x22b   :  { %v1321_v32 = vclamps-f32 %v766_v30, 1.0 }
 0x22c   :  { %v815_v47 = vunpack.c.l.bf16 %v810_v45  ;;  %v816_v7 = vunpack.c.h.bf16 %v810_v45 }
 0x22d   :  { %v772_v37 = vpack.c.bf16 %v1321_v32, %v1320_v61 }
 0x22e   :  { %v2076_v4 = vmul.f32 %v815_v47, %v435_v17  ;;  %v2080_v6 = vmul.f32 %v816_v7, %v436_v18 }
 0x22f   :  { %v779_v23 = vunpack.c.l.bf16 %v772_v37  ;;  %v780_v3 = vunpack.c.h.bf16 %v772_v37 }
 0x231   :  { %v787_v44 = vadd.f32 1.0, %v779_v23  ;;  %v788_v46 = vadd.f32 1.0, %v780_v3 }
 0x233   :  { %v792_v31 = vpack.c.bf16 %v788_v46, %v787_v44 }
 0x235   :  { %v799_v16 = vunpack.c.l.bf16 %v792_v31  ;;  %v800_v22 = vunpack.c.h.bf16 %v792_v31 }
 0x237   :  { %v807_v55 = vmul.f32 0.5, %v799_v16  ;;  %v808_v0 = vmul.f32 0.5, %v800_v22 }
 0x239   :  { %v812_v12 = vpack.c.bf16 %v808_v0, %v807_v55 }
 0x23b   :  { %v819_v51 = vunpack.c.l.bf16 %v812_v12  ;;  %v820_v59 = vunpack.c.h.bf16 %v812_v12 }
 0x23d   :  { %v2084_v34 = vmul.f32 %v819_v51, %v439_v56  ;;  %v2088_v58 = vmul.f32 %v820_v59, %v440_v19 }
 0x23f   :  { %v831_v48 = vpack.c.bf16 %v2084_v34, %v2076_v4  ;;  %v832_v49 = vpack.c.bf16 %v2088_v58, %v2080_v6 }
 0x240   :  { %1645 = dma.done.wait [#allocation4 + $0x1], 4096 }
 0x241   :  { %1646 = vsyncadd [#allocation4 + $0x1], 4294963200  ;;  %v1491_v17 = vld [vmem:[#allocation3 + $0x38] sm:$0xff]  ;;  %v1490_v56 = vld [vmem:[#allocation3 + $0x30] sm:$0xff]  ;;  %v901_v23 = vperm.slane %v1709_v28, 3  ;;  %s1655_s1 = smov [#allocation8]  }
 0x242   :  { %v1499_v14 = vld [vmem:[#allocation3 + $0x78] sm:$0xff]  ;;  %1094 = vmatpush.bf16.msrb.mxu0 %v1491_v17  ;;  %v1498_v8 = vld [vmem:[#allocation3 + $0x70] sm:$0xff]  ;;  %v1489_v40 = vld [vmem:[#allocation3 + $0x28] sm:$0xff]  ;;  %s1158_s3 = sshll.u32 %s1655_s1, 4  ;;  %s1160_s10 = sshll.u32 %s2119_s4, 4  ;;  %s1159_s3 = int_to_ptr.vmem [resolvable:$true] %s1158_s3  ;;  %s1161_s10 = int_to_ptr.hbm [resolvable:$true] %s1160_s10 }
 0x243   :  { %v1507_v18 = vld [vmem:[#allocation3 + $0xb8] sm:$0xff]  ;;  %1108 = vmatpush.bf16.msrb.mxu1 %v1499_v14  ;;  %v1506_v33 = vld [vmem:[#allocation3 + $0xb0] sm:$0xff]  ;;  %v1497_v42 = vld [vmem:[#allocation3 + $0x68] sm:$0xff] }
 0x244   :  { %v1515_v13 = vld [vmem:[#allocation3 + $0xf8] sm:$0xff]  ;;  %1122 = vmatpush.bf16.msrb.mxu2 %v1507_v18  ;;  %v1514_v19 = vld [vmem:[#allocation3 + $0xf0] sm:$0xff]  ;;  %v1505_v53 = vld [vmem:[#allocation3 + $0xa8] sm:$0xff] }
 0x245   :  { %1136 = vmatpush.bf16.msrb.mxu3 %v1515_v13  ;;  %v1513_v24 = vld [vmem:[#allocation3 + $0xe8] sm:$0xff]  ;;  %v1488_v29 = vld [vmem:[#allocation3 + $0x20] sm:$0xff]  ;;  %v1487_v57 = vld [vmem:[#allocation3 + $0x18] sm:$0xff] }
 0x246   :  { %1095 = vmatpush.bf16.msrb.mxu0 %v1490_v56  ;;  %v1496_v10 = vld [vmem:[#allocation3 + $0x60] sm:$0xff]  ;;  %v1495_v63 = vld [vmem:[#allocation3 + $0x58] sm:$0xff]  ;;  %v1486_v26 = vld [vmem:[#allocation3 + $0x10] sm:$0xff] }
 0x247   :  { %1109 = vmatpush.bf16.msrb.mxu1 %v1498_v8  ;;  %v1504_v20 = vld [vmem:[#allocation3 + $0xa0] sm:$0xff]  ;;  %v1503_v54 = vld [vmem:[#allocation3 + $0x98] sm:$0xff]  ;;  %v1494_v43 = vld [vmem:[#allocation3 + $0x50] sm:$0xff] }
 0x248   :  { %1123 = vmatpush.bf16.msrb.mxu2 %v1506_v33  ;;  %v1512_v36 = vld [vmem:[#allocation3 + $0xe0] sm:$0xff]  ;;  %v1511_v52 = vld [vmem:[#allocation3 + $0xd8] sm:$0xff]  ;;  %v1502_v27 = vld [vmem:[#allocation3 + $0x90] sm:$0xff] }
 0x249   :  { %1137 = vmatpush.bf16.msrb.mxu3 %v1514_v19  ;;  %v1510_v50 = vld [vmem:[#allocation3 + $0xd0] sm:$0xff]  ;;  %v1485_v21 = vld [vmem:[#allocation3 + $0x8] sm:$0xff]  ;;  %v1484_v32 = vld [vmem:[#allocation3] sm:$0xff] }
 0x24a   :  { %1096 = vmatpush.bf16.msrb.mxu0 %v1489_v40  ;;  %v1493_v60 = vld [vmem:[#allocation3 + $0x48] sm:$0xff]  ;;  %v1492_v11 = vld [vmem:[#allocation3 + $0x40] sm:$0xff] }
 0x24b   :  { %1110 = vmatpush.bf16.msrb.mxu1 %v1497_v42  ;;  %v1501_v61 = vld [vmem:[#allocation3 + $0x88] sm:$0xff]  ;;  %v1500_v41 = vld [vmem:[#allocation3 + $0x80] sm:$0xff] }
 0x24c   :  { %1124 = vmatpush.bf16.msrb.mxu2 %v1505_v53  ;;  %v1509_v30 = vld [vmem:[#allocation3 + $0xc8] sm:$0xff]  ;;  %v1508_v37 = vld [vmem:[#allocation3 + $0xc0] sm:$0xff] }
 0x24d   :  { %1138 = vmatpush.bf16.msrb.mxu3 %v1513_v24 }
 0x24e   :  { %1097 = vmatpush.bf16.msrb.mxu0 %v1488_v29 }
 0x24f   :  { %1111 = vmatpush.bf16.msrb.mxu1 %v1496_v10 }
 0x250   :  { %1125 = vmatpush.bf16.msrb.mxu2 %v1504_v20 }
 0x251   :  { %1139 = vmatpush.bf16.msrb.mxu3 %v1512_v36 }
 0x252   :  { %1098 = vmatpush.bf16.msrb.mxu0 %v1487_v57 }
 0x253   :  { %1112 = vmatpush.bf16.msrb.mxu1 %v1495_v63 }
 0x254   :  { %1126 = vmatpush.bf16.msrb.mxu2 %v1503_v54 }
 0x255   :  { %1140 = vmatpush.bf16.msrb.mxu3 %v1511_v52 }
 0x256   :  { %1099 = vmatpush.bf16.msrb.mxu0 %v1486_v26 }
 0x257   :  { %1113 = vmatpush.bf16.msrb.mxu1 %v1494_v43 }
 0x258   :  { %1127 = vmatpush.bf16.msrb.mxu2 %v1502_v27 }
 0x259   :  { %1141 = vmatpush.bf16.msrb.mxu3 %v1510_v50 }
 0x25a   :  { %1100 = vmatpush.bf16.msrb.mxu0 %v1485_v21 }
 0x25b   :  { %1114 = vmatpush.bf16.msrb.mxu1 %v1493_v60 }
 0x25c   :  { %1128 = vmatpush.bf16.msrb.mxu2 %v1501_v61 }
 0x25d   :  { %1142 = vmatpush.bf16.msrb.mxu3 %v1509_v30 }
 0x25e   :  { %1101 = vmatpush.bf16.msrb.mxu0 %v1484_v32 }
 0x25f   :  { %1115 = vmatpush.bf16.msrb.mxu1 %v1492_v11 }
 0x260   :  { %1129 = vmatpush.bf16.msrb.mxu2 %v1500_v41 }
 0x261   :  { %1143 = vmatpush.bf16.msrb.mxu3 %v1508_v37  ;;  %1102 = vmatmul.bf16.vlgmr.msrb.gmra.mxu0 %v829_v5 }
 0x262   :  { %1116 = vmatmul.bf16.vlgmr.msrb.gmra.mxu1 %v830_v35 }
 0x263   :  { %1130 = vmatmul.bf16.vlgmr.msrb.gmra.mxu2 %v831_v48 }
 0x264   :  { %1144 = vmatmul.bf16.vlgmr.msrb.gmra.mxu3 %v832_v49 }
 0x2de   :  { %v1103_v3 = vpop.f32.mrf.mxu0 }
 0x2df   :  { %v1104_v39 = vadd.f32 %v1103_v3, %v901_v23  ;;  %v1117_v15 = vpop.f32.mrf.mxu1 }
 0x2e1   :  { %v1118_v44 = vadd.f32 %v1117_v15, %v1104_v39 }
 0x2e6   :  { %v1131_v38 = vpop.f32.mrf.mxu2  ;;  %v1105_v46 = vpop.f32.mrf.mxu0 }
 0x2e7   :  { %v1145_v9 = vpop.f32.mrf.mxu3  ;;  %v1132_v5 = vadd.f32 %v1131_v38, %v1118_v44  ;;  %v1106_v62 = vadd.f32 %v1105_v46, %v901_v23  ;;  %v1119_v31 = vpop.f32.mrf.mxu1 }
 0x2e9   :  { %v1146_v25 = vadd.f32 %v1145_v9, %v1132_v5  ;;  %v1120_v45 = vadd.f32 %v1119_v31, %v1106_v62 }
 0x2eb   :  { %v1150_v35 = vadd.f32 %v1146_v25, %v1692_v1 }
 0x2ed   :  { %1152 = vst [vmem:[#allocation8] sm:$0xff] %v1150_v35 }
 0x2ee   :  { %v1133_v16 = vpop.f32.mrf.mxu2 }
 0x2ef   :  { %v1134_v22 = vadd.f32 %v1133_v16, %v1120_v45  ;;  %v1147_v55 = vpop.f32.mrf.mxu3 }
 0x2f1   :  { %v1148_v28 = vadd.f32 %v1147_v55, %v1134_v22 }
 0x2f3   :  { %v1151_v0 = vadd.f32 %v1148_v28, %v1695_v2 }
 0x2f5   :  { %1153 = vst [vmem:[#allocation8 + $0x8] sm:$0xff] %v1151_v0 }
 0x2f6   :  { %1166 = dma.vmem_to_hbm [thread:$0]  %s1159_s3, 256, %s1161_s10, [#allocation7], %s1650_s20, %s1650_s20, %s1651_s21  }
 0x2f7   :  { %1647 = dma.done.wait [#allocation7], 256  }
 0x2f8   :  { %1648 = vsyncadd [#allocation7], 4294967040 }
 0x2f9   :  { %1171 = vsyncpa [#allocation6], 1 }
 0x2fa   :  { %1172 = vsyncpa [#allocation7], 1 }
 0x2fb   :  { %1173 = vsyncmov [#allocation4] }
 0x2fe   :  { %s1174_s11 = vpop.sfrf %1173 }
 0x2ff   :  { %p1450_p0 = scmp.ne.s32.totalorder %s1174_s11, 0 }
 0x301   :  { %1178 = shalt.err (%p1450_p0)  }
 0x302   :  { %1180 = vsyncmov [#allocation4 + $0x1] }
 0x305   :  { %s1181_s4 = vpop.sfrf %1180 }
 0x306   :  { %p1451_p1 = scmp.ne.s32.totalorder %s1181_s4, 0 }
 0x308   :  { %1185 = shalt.err (%p1451_p1)  }

</bundles_post_ra>
